<compile_context>
chip_gen: v6e
topology: v6e:2x2x1
jax: 0.10.0
libtpu: 0.0.40
codegen_flags: <defaults>
</compile_context>

<pallas_src>
import jax
import jax.numpy as jnp
from jax.experimental import pallas as pl
from jax.experimental.pallas import tpu as pltpu

HIDDEN = 768        # fan_out of the encoder, fixed by the module
C_PAD = 128         # class dim padded to one full lane width
NEG_PAD = -1e30     # large finite negative for padded class lanes (avoids inf-inf)


def _round_up(x, m):
    return ((x + m - 1) // m) * m


def classifier_head_kernel(cls_ref, w_ref, b_ref, out_ref):
    # cls_ref: (tb, H) bf16   w_ref: (H, C_PAD) bf16   b_ref: (1, C_PAD) f32
    # dropout(p=0.1): inference / eval mode -> identity (no scaling, no masking)
    logits = jnp.dot(cls_ref[...], w_ref[...],
                     preferred_element_type=jnp.float32) + b_ref[...]  # (tb, C_PAD) f32
    # padded class lanes carry bias = -1e30 -> exp underflows to exactly 0 below,
    # so no explicit lane mask is needed in the hot path.
    m = jnp.max(logits, axis=1, keepdims=True)
    shifted = logits - m
    lse = jnp.log(jnp.sum(jnp.exp(shifted), axis=1, keepdims=True))
    out_ref[...] = (shifted - lse).astype(out_ref.dtype)


def classifier_head(cls_feats_bf16, w_t, b, n_class, *, tb_max=1024):
    """cls_feats_bf16: (B, H) bf16, w_t: (H, C) f32, b: (C,) f32 -> (B, C) f32 log-probs."""
    B, H = cls_feats_bf16.shape
    assert H == HIDDEN
    C = w_t.shape[1]
    assert C <= C_PAD and n_class == C

    # batch tile: multiple of 16 (bf16 packs 2 rows/sublane), capped so the grid
    # keeps >= 2 steps for large B (v7x: 2 TCs shard the "parallel" axis).
    tb = min(tb_max, max(16, _round_up(pl.cdiv(B, 2), 16)))
    B_pad = _round_up(B, tb)

    # batch padding only if actually needed (avoids an extra pass when B % tb == 0)
    if B_pad != B:
        cls_p = jnp.zeros((B_pad, H), jnp.bfloat16).at[:B].set(cls_feats_bf16)
    else:
        cls_p = cls_feats_bf16

    # weight transposed + lane-padded, bf16 operands (f32 accumulation on the MXU)
    w_p = jnp.zeros((H, C_PAD), jnp.bfloat16).at[:, :C].set(w_t.astype(jnp.bfloat16))
    # class-padding mask folded into the bias: padded lanes get a huge negative
    b_p = jnp.full((1, C_PAD), NEG_PAD, jnp.float32).at[:, :C].set(
        b.reshape(1, C).astype(jnp.float32))

    out = pl.pallas_call(
        classifier_head_kernel,
        out_shape=jax.ShapeDtypeStruct((B_pad, C_PAD), jnp.float32),
        grid=(B_pad // tb,),
        in_specs=[
            pl.BlockSpec((tb, H), lambda i: (i, 0)),      # CLS rows, tiled over batch
            pl.BlockSpec((H, C_PAD), lambda i: (0, 0)),   # W^T: resident, same block each step
            pl.BlockSpec((1, C_PAD), lambda i: (0, 0)),   # bias: resident
        ],
        out_specs=pl.BlockSpec((tb, C_PAD), lambda i: (i, 0)),  # lane-dense output
        compiler_params=pltpu.CompilerParams(
            dimension_semantics=("parallel",)),
    )(cls_p, w_p, b_p)
    return out[:B, :n_class]


def base_classifier_forward(input_ids, attention_mask, params):
    """Mirrors BaseClassifier.forward (eval mode)."""
    emb_table, w_t, b = params["emb"], params["w_t"], params["b"]
    # ---- synthetic deterministic "encoder" (glue, plain JAX) ----
    # only the CLS position feeds the head; bf16 cast fuses into the elementwise mask op
    cls_feats = (emb_table[input_ids[:, 0]]
                 * attention_mask[:, 0, None].astype(jnp.float32)).astype(jnp.bfloat16)
    # ---- Pallas kernel: (dropout id) -> linear -> log_softmax ----
    return classifier_head(cls_feats, w_t, b, n_class=w_t.shape[1])


if __name__ == "__main__":
    B, S, VOCAB, N_CLASS = 2, 8, 32, 4

    key = jax.random.PRNGKey(0)
    k_emb, k_w, k_b, k_ids = jax.random.split(key, 4)

    # Deterministic parameter init (shapes follow the module's __init__)
    emb_table = (0.02 * jax.random.normal(k_emb, (VOCAB, HIDDEN))).astype(jnp.float32)
    bound = 1.0 / (HIDDEN ** 0.5)                       # nn.Linear default init bound
    w = jax.random.uniform(k_w, (N_CLASS, HIDDEN), minval=-bound, maxval=bound)
    b = jax.random.uniform(k_b, (N_CLASS,), minval=-bound, maxval=bound)
    params = {
        "emb": emb_table,
        "w_t": jnp.asarray(w.T, jnp.float32),           # store transposed for the kernel
        "b": jnp.asarray(b, jnp.float32),
    }

    input_ids = jax.random.randint(k_ids, (B, S), 0, VOCAB, dtype=jnp.int32)
    attention_mask = jnp.ones((B, S), dtype=jnp.int32)

    out = base_classifier_forward(input_ids, attention_mask, params)
    out = jax.block_until_ready(out)

    # Pure-JAX reference check of the head (same bf16 matmul operands, f32 accum)
    cls_ref = (params["emb"][input_ids[:, 0]]
               * attention_mask[:, 0, None].astype(jnp.float32)).astype(jnp.bfloat16)
    logits_ref = jnp.dot(cls_ref, params["w_t"].astype(jnp.bfloat16),
                         preferred_element_type=jnp.float32) + params["b"][None, :]
    ref = jax.nn.log_softmax(logits_ref, axis=1)
    assert out.shape == (B, N_CLASS)
    assert jnp.allclose(out, ref, atol=1e-3), "mismatch vs JAX reference"

    print("KERNEL_OK")
</pallas_src>

<mosaic_0001>
module attributes {stable_mosaic.version = 11 : i64} {
  func.func @classifier_head_kernel(%arg0: i32, %arg1: memref<16x768xbf16, #tpu.memory_space<vmem>>, %arg2: memref<768x128xbf16, #tpu.memory_space<vmem>>, %arg3: memref<1x128xf32, #tpu.memory_space<vmem>>, %arg4: memref<16x128xf32, #tpu.memory_space<vmem>>) attributes {dimension_semantics = [#tpu.dimension_semantics<parallel>], iteration_bounds = array<i64: 1>, scalar_prefetch = 0 : i64, scratch_operands = 0 : i64, tpu.core_type = #tpu.core_type<tc>, window_params = [{transform_indices = @transform_0, window_bounds = array<i64: 16, 768>}, {pipeline_mode = #tpu.pipeline_mode<synchronous>, transform_indices = @transform_1, window_bounds = array<i64: 768, 128>}, {pipeline_mode = #tpu.pipeline_mode<synchronous>, transform_indices = @transform_2, window_bounds = array<i64: 1, 128>}, {transform_indices = @transform_3, window_bounds = array<i64: 16, 128>}]} {
    %c0 = arith.constant 0 : index
    %c0_0 = arith.constant 0 : index
    %0 = vector.load %arg1[%c0, %c0_0] : memref<16x768xbf16, #tpu.memory_space<vmem>>, vector<16x768xbf16>
    %c0_1 = arith.constant 0 : index
    %c0_2 = arith.constant 0 : index
    %1 = vector.load %arg2[%c0_1, %c0_2] : memref<768x128xbf16, #tpu.memory_space<vmem>>, vector<768x128xbf16>
    %cst = arith.constant dense<0.000000e+00> : vector<16x128xf32>
    %2 = tpu.matmul %0, %1, %cst {dimension_numbers = #tpu.dot_dimension_numbers<[1], [0], [0], [1], [0, 0, 1, 1], [], []>} : vector<16x768xbf16>, vector<768x128xbf16>, vector<16x128xf32> -> vector<16x128xf32>
    %c0_3 = arith.constant 0 : index
    %c0_4 = arith.constant 0 : index
    %3 = vector.load %arg3[%c0_3, %c0_4] : memref<1x128xf32, #tpu.memory_space<vmem>>, vector<1x128xf32>
    %4 = vector.broadcast %3 : vector<1x128xf32> to vector<16x128xf32>
    %5 = arith.addf %2, %4 : vector<16x128xf32>
    %cst_5 = arith.constant dense<0xFF800000> : vector<16xf32>
    %6 = vector.multi_reduction <maximumf>, %5, %cst_5 [1] : vector<16x128xf32> to vector<16xf32>
    %7 = vector.shape_cast %6 : vector<16xf32> to vector<16x1xf32>
    %8 = vector.broadcast %7 : vector<16x1xf32> to vector<16x128xf32>
    %9 = arith.subf %5, %8 : vector<16x128xf32>
    %10 = math.exp %9 : vector<16x128xf32>
    %cst_6 = arith.constant dense<0.000000e+00> : vector<16xf32>
    %11 = vector.multi_reduction <add>, %10, %cst_6 [1] : vector<16x128xf32> to vector<16xf32>
    %12 = vector.shape_cast %11 : vector<16xf32> to vector<16x1xf32>
    %13 = math.log %12 : vector<16x1xf32>
    %14 = vector.broadcast %13 : vector<16x1xf32> to vector<16x128xf32>
    %15 = arith.subf %9, %14 : vector<16x128xf32>
    %c0_7 = arith.constant 0 : index
    %c0_8 = arith.constant 0 : index
    %16 = vector.load %arg4[%c0_7, %c0_8] : memref<16x128xf32, #tpu.memory_space<vmem>>, vector<16x128xf32>
    tpu.vector_store %arg4[%c0_7, %c0_8], %15 {strides = array<i32>} : memref<16x128xf32, #tpu.memory_space<vmem>>, vector<16x128xf32>,
    return
  }
  func.func @transform_0(%arg0: i32) -> (i32, i32) {
    %c0_i32 = arith.constant 0 : i32
    %c0_i32_0 = arith.constant 0 : i32
    return %arg0, %c0_i32 : i32, i32
  }
  func.func @transform_1(%arg0: i32) -> (i32, i32) {
    %c0_i32 = arith.constant 0 : i32
    %c0_i32_0 = arith.constant 0 : i32
    %c0_i32_1 = arith.constant 0 : i32
    return %c0_i32, %c0_i32_0 : i32, i32
  }
  func.func @transform_2(%arg0: i32) -> (i32, i32) {
    %c0_i32 = arith.constant 0 : i32
    %c0_i32_0 = arith.constant 0 : i32
    %c0_i32_1 = arith.constant 0 : i32
    return %c0_i32, %c0_i32_0 : i32, i32
  }
  func.func @transform_3(%arg0: i32) -> (i32, i32) {
    %c0_i32 = arith.constant 0 : i32
    %c0_i32_0 = arith.constant 0 : i32
    return %arg0, %c0_i32 : i32, i32
  }
}

</mosaic_0001>

<bundles_post_ra>
// kernel: tpu_custom_call.1
= control target key start
LH: loop header
LB: loop body
LE: loop exit
PB: predicated region body
PF: predicated region fallthrough
CT: control target
= control target key end

     0   :  { %8 = vsyncpa [#allocation3], 0  ;;  %s936_s0 = inlined_call_operand.hbm [shape: bf16[16,768], index: 0, kind: input, shape index: {}]   ;;  %s937_s1 = inlined_call_operand.hbm [shape: bf16[768,128], index: 1, kind: input, shape index: {}]   ;;  %s938_s2 = inlined_call_operand.vmem [shape: f32[1,128], index: 2, kind: input, shape index: {}]   ;;  %s939_s3 = inlined_call_operand.hbm [shape: f32[16,128], index: 3, kind: output, shape index: {}]  }
   0x1   :  { %9 = vsyncpa [#allocation6], 0 }
   0x2   :  { %10 = vsyncpa [#allocation4], 0  ;;  %s895_s12 = smov [#allocation2]  }
   0x3   :  { %s16_s13 = sshll.u32 %s895_s12, 4  ;;  %s17_s13 = int_to_ptr.vmem [resolvable:$true] %s16_s13 }
   0x4   :  { %s837_s14 = scalar_lea.vmem %s17_s13, 768  ;;  %p842_p1 = scmp.lt.s32.totalorder %s17_s13, %s17_s13 }
   0x5   :  { %p838_p0 = scmp.ne.s32.totalorder %s17_s13, %s837_s14  ;;  %p843_p2 = scmp.lt.s32.totalorder %s837_s14, %s837_s14 }
   0x7   :  { %p844_p3 = por %p843_p2, %p842_p1 }
   0x9   :  { %p845_p4 = pnand %p844_p3, %p838_p0 }
   0xb   :  { %848 = shalt.err (!%p845_p4)
}
   0xc   :  { %s896_s15 = smov 384   ;;  %s897_s16 = smov 24  }
   0xd   :  { %22 = dma.hbm_to_vmem [thread:$0]  %s936_s0, 768, %s17_s13, [#allocation3], %s896_s15, %s896_s15, %s897_s16  }
   0xe   :  { %s898_s19 = smov [#allocation5]  }
   0xf   :  { %s28_s20 = sshll.u32 %s898_s19, 4  ;;  %s29_s20 = int_to_ptr.vmem [resolvable:$true] %s28_s20 }
  0x10   :  { %s857_s21 = scalar_lea.vmem %s29_s20, 6144  ;;  %p862_p6 = scmp.lt.s32.totalorder %s29_s20, %s29_s20 }
  0x11   :  { %p858_p5 = scmp.ne.s32.totalorder %s29_s20, %s857_s21  ;;  %p863_p7 = scmp.lt.s32.totalorder %s857_s21, %s857_s21 }
  0x13   :  { %p864_p8 = por %p863_p7, %p862_p6 }
  0x15   :  { %p865_p9 = pnand %p864_p8, %p858_p5 }
  0x17   :  { %868 = shalt.err (!%p865_p9)
}
  0x18   :  { %s899_s22 = smov 64   ;;  %s900_s23 = smov 4  }
  0x19   :  { %34 = dma.hbm_to_vmem [thread:$0]  %s937_s1, 6144, %s29_s20, [#allocation6], %s899_s22, %s899_s22, %s900_s23  }
  0x1a   :  { %889 = dma.done.wait [#allocation3], 768  }
  0x1b   :  { %890 = vsyncadd [#allocation3], 4294966528 }
  0x1c   :  { %891 = dma.done.wait [#allocation6], 6144  }
  0x1d   :  { %892 = vsyncadd [#allocation6], 4294961152  ;;  %v764_v0 = vld [vmem:[#allocation5 + $0x78] sm:$0xff]   ;;  %v768_v4 = vld [vmem:[#allocation5 + $0x70] sm:$0xff]  }
  0x1e   :  { %v765_v1 = vld [vmem:[#allocation5 + $0x38] sm:$0xff]   ;;  %689 = vmatprep.subr.bf16.mxu0 %v764_v0  ;;  %v769_v5 = vld [vmem:[#allocation5 + $0x30] sm:$0xff]   ;;  %v772_v8 = vld [vmem:[#allocation5 + $0x68] sm:$0xff]  }
  0x1f   :  { %v766_v2 = vld [vmem:[#allocation5 + $0xf8] sm:$0xff]   ;;  %690 = vmatpush3.bf16.msra.mxu0 %v765_v1  ;;  %v770_v6 = vld [vmem:[#allocation5 + $0xf0] sm:$0xff]   ;;  %v773_v9 = vld [vmem:[#allocation5 + $0x28] sm:$0xff]  }
  0x20   :  { %v767_v3 = vld [vmem:[#allocation5 + $0xb8] sm:$0xff]   ;;  %711 = vmatprep.subr.bf16.mxu1 %v766_v2  ;;  %691 = vmatprep.subr.bf16.mxu0 %v768_v4  ;;  %v771_v7 = vld [vmem:[#allocation5 + $0xb0] sm:$0xff]   ;;  %v774_v10 = vld [vmem:[#allocation5 + $0xe8] sm:$0xff]  }
  0x21   :  { %712 = vmatpush3.bf16.msra.mxu1 %v767_v3  ;;  %v775_v11 = vld [vmem:[#allocation5 + $0xa8] sm:$0xff]   ;;  %v776_v12 = vld [vmem:[#allocation5 + $0x60] sm:$0xff]   ;;  %v780_v16 = vld [vmem:[#allocation5 + $0x58] sm:$0xff]  }
  0x22   :  { %713 = vmatprep.subr.bf16.mxu1 %v770_v6  ;;  %v777_v13 = vld [vmem:[#allocation5 + $0x20] sm:$0xff]   ;;  %v781_v17 = vld [vmem:[#allocation5 + $0x18] sm:$0xff]   ;;  %v784_v20 = vld [vmem:[#allocation5 + $0x50] sm:$0xff]  }
  0x23   :  { %692 = vmatpush3.bf16.msra.mxu0 %v769_v5  ;;  %v778_v14 = vld [vmem:[#allocation5 + $0xe0] sm:$0xff]   ;;  %v782_v18 = vld [vmem:[#allocation5 + $0xd8] sm:$0xff]   ;;  %v785_v21 = vld [vmem:[#allocation5 + $0x10] sm:$0xff]  }
  0x24   :  { %693 = vmatprep.subr.bf16.mxu0 %v772_v8  ;;  %v779_v15 = vld [vmem:[#allocation5 + $0xa0] sm:$0xff]   ;;  %v783_v19 = vld [vmem:[#allocation5 + $0x98] sm:$0xff]   ;;  %v786_v22 = vld [vmem:[#allocation5 + $0xd0] sm:$0xff]  }
  0x25   :  { %714 = vmatpush3.bf16.msra.mxu1 %v771_v7  ;;  %v787_v23 = vld [vmem:[#allocation5 + $0x90] sm:$0xff]   ;;  %v788_v24 = vld [vmem:[#allocation5 + $0x48] sm:$0xff]   ;;  %v792_v28 = vld [vmem:[#allocation5 + $0x40] sm:$0xff]  }
  0x26   :  { %715 = vmatprep.subr.bf16.mxu1 %v774_v10  ;;  %v789_v25 = vld [vmem:[#allocation5 + $0x8] sm:$0xff]   ;;  %v793_v29 = vld [vmem:[#allocation5] sm:$0xff]   ;;  %v799_v34 = vld [vmem:[#allocation5 + $0x178] sm:$0xff]  }
  0x27   :  { %694 = vmatpush3.bf16.msra.mxu0 %v773_v9  ;;  %v790_v26 = vld [vmem:[#allocation5 + $0xc8] sm:$0xff]   ;;  %v794_v30 = vld [vmem:[#allocation5 + $0xc0] sm:$0xff]   ;;  %v800_v35 = vld [vmem:[#allocation2 + $0x8] ss:$24 sps:$4 sm:$0xff]  }
  0x28   :  { %695 = vmatprep.subr.bf16.mxu0 %v776_v12  ;;  %v791_v27 = vld [vmem:[#allocation5 + $0x88] sm:$0xff]   ;;  %v798_v33 = vld [vmem:[#allocation5 + $0x80] sm:$0xff]   ;;  %v802_v36 = vld [vmem:[#allocation2 + $0xc] ss:$24 sps:$4 sm:$0xff]  }
  0x29   :  { %716 = vmatpush3.bf16.msra.mxu1 %v775_v11  ;;  %v795_v31 = vld [vmem:[#allocation2] ss:$24 sps:$4 sm:$0xff]   ;;  %v797_v32 = vld [vmem:[#allocation2 + $0x4] ss:$24 sps:$4 sm:$0xff]   ;;  %v803_v37 = vld [vmem:[#allocation5 + $0x138] sm:$0xff]   ;;  %544 = vmatprep.mubr.bf16.mxu1 %v802_v36 }
  0x2a   :  { %717 = vmatprep.subr.bf16.mxu1 %v778_v14  ;;  %503 = vmatprep.mubr.bf16.mxu0 %v797_v32  ;;  %v804_v38 = vld [vmem:[#allocation5 + $0x170] sm:$0xff]   ;;  %v806_v40 = vld [vmem:[#allocation5 + $0x168] sm:$0xff]   ;;  %v808_v42 = vld [vmem:[#allocation5 + $0x160] sm:$0xff]  }
  0x2b   :  { %696 = vmatpush3.bf16.msra.mxu0 %v777_v13  ;;  %v805_v39 = vld [vmem:[#allocation5 + $0x130] sm:$0xff]   ;;  %v807_v41 = vld [vmem:[#allocation5 + $0x128] sm:$0xff]   ;;  %v809_v43 = vld [vmem:[#allocation5 + $0x120] sm:$0xff]  }
  0x2c   :  { %697 = vmatprep.subr.bf16.mxu0 %v780_v16  ;;  %v810_v44 = vld [vmem:[#allocation5 + $0x158] sm:$0xff]   ;;  %v812_v46 = vld [vmem:[#allocation5 + $0x150] sm:$0xff]   ;;  %v814_v49 = vld [vmem:[#allocation5 + $0x148] sm:$0xff]  }
  0x2d   :  { %718 = vmatpush3.bf16.msra.mxu1 %v779_v15  ;;  %v811_v45 = vld [vmem:[#allocation5 + $0x118] sm:$0xff]   ;;  %v813_v48 = vld [vmem:[#allocation5 + $0x110] sm:$0xff]   ;;  %v815_v50 = vld [vmem:[#allocation5 + $0x108] sm:$0xff]  }
  0x2e   :  { %719 = vmatprep.subr.bf16.mxu1 %v782_v18  ;;  %v820_v47 = vld [vmem:[#allocation2 + $0x14] ss:$24 sps:$4 sm:$0xff]   ;;  %v818_v53 = vld [vmem:[#allocation2 + $0x10] ss:$24 sps:$4 sm:$0xff]   ;;  %v634_v60 = vld [vmem:[%s938_s2] ss:$0 sm:$0xff] }
  0x2f   :  { %698 = vmatpush3.bf16.msra.mxu0 %v781_v17  ;;  %v816_v51 = vld [vmem:[#allocation5 + $0x140] sm:$0xff]   ;;  %s901_s2 = smov [#allocation7]  }
  0x30   :  { %699 = vmatprep.subr.bf16.mxu0 %v784_v20  ;;  %v817_v52 = vld [vmem:[#allocation5 + $0x100] sm:$0xff]   ;;  %s621_s26 = sshll.u32 %s901_s2, 4  ;;  %s622_s26 = int_to_ptr.vmem [resolvable:$true] %s621_s26 }
  0x31   :  { %720 = vmatpush3.bf16.msra.mxu1 %v783_v19  ;;  %s869_s27 = scalar_lea.vmem %s622_s26, 256  ;;  %p874_p11 = scmp.lt.s32.totalorder %s622_s26, %s622_s26 }
  0x32   :  { %721 = vmatprep.subr.bf16.mxu1 %v786_v22  ;;  %p870_p10 = scmp.ne.s32.totalorder %s622_s26, %s869_s27  ;;  %p875_p12 = scmp.lt.s32.totalorder %s869_s27, %s869_s27 }
  0x33   :  { %700 = vmatpush3.bf16.msra.mxu0 %v785_v21 }
  0x34   :  { %701 = vmatprep.subr.bf16.mxu0 %v788_v24  ;;  %p876_p13 = por %p875_p12, %p874_p11 }
  0x35   :  { %722 = vmatpush3.bf16.msra.mxu1 %v787_v23 }
  0x36   :  { %723 = vmatprep.subr.bf16.mxu1 %v790_v26  ;;  %p877_p0 = pnand %p876_p13, %p870_p10 }
  0x37   :  { %702 = vmatpush3.bf16.msra.mxu0 %v789_v25 }
  0x38   :  { %703 = vmatprep.subr.bf16.mxu0 %v792_v28 }
  0x39   :  { %724 = vmatpush3.bf16.msra.mxu1 %v791_v27 }
  0x3a   :  { %725 = vmatprep.subr.bf16.mxu1 %v794_v30 }
  0x3b   :  { %704 = vmatpush3.bf16.msra.mxu0 %v793_v29 }
  0x3c   :  { %733 = vmatprep.subr.bf16.mxu0 %v799_v34 }
  0x3d   :  { %726 = vmatpush3.bf16.msra.mxu1 %v798_v33 }
  0x3e   :  { %504 = vmatmul.mubr.bf16.vlgmr.msra.gmra.mxu0 %v795_v31 }
  0x3f   :  { %734 = vmatpush3.bf16.msra.mxu0 %v803_v37  ;;  %585 = vmatprep.mubr.bf16.mxu0 %v820_v47 }
  0x40   :  { %545 = vmatmul.mubr.bf16.vlgmr.msra.gmra.mxu1 %v800_v35  ;;  %735 = vmatprep.subr.bf16.mxu0 %v804_v38 }
  0x43   :  { %736 = vmatpush3.bf16.msra.mxu0 %v805_v39 }
  0x44   :  { %737 = vmatprep.subr.bf16.mxu0 %v806_v40 }
  0x47   :  { %738 = vmatpush3.bf16.msra.mxu0 %v807_v41 }
  0x48   :  { %739 = vmatprep.subr.bf16.mxu0 %v808_v42 }
  0x4b   :  { %740 = vmatpush3.bf16.msra.mxu0 %v809_v43 }
  0x4c   :  { %741 = vmatprep.subr.bf16.mxu0 %v810_v44 }
  0x4f   :  { %742 = vmatpush3.bf16.msra.mxu0 %v811_v45 }
  0x50   :  { %743 = vmatprep.subr.bf16.mxu0 %v812_v46 }
  0x53   :  { %744 = vmatpush3.bf16.msra.mxu0 %v813_v48 }
  0x54   :  { %745 = vmatprep.subr.bf16.mxu0 %v814_v49 }
  0x57   :  { %746 = vmatpush3.bf16.msra.mxu0 %v815_v50 }
  0x58   :  { %747 = vmatprep.subr.bf16.mxu0 %v816_v51 }
  0x5b   :  { %748 = vmatpush3.bf16.msra.mxu0 %v817_v52 }
  0x5e   :  { %586 = vmatmul.mubr.bf16.vlgmr.msra.gmra.mxu0 %v818_v53 }
  0xfe   :  { %v705_v54 = vpop.f32.mrf.mxu0 }
 0x100   :  { %v706_v55 = vpop.f32.mrf.mxu0  ;;  %v727_v56 = vpop.f32.mrf.mxu1 }
 0x101   :  { %v707_v59 = vadd.f32 %v706_v55, %v705_v54 }
 0x102   :  { %v708_v57 = vpop.f32.mrf.mxu0  ;;  %v728_v58 = vpop.f32.mrf.mxu1 }
 0x103   :  { %v506_v63 = vadd.f32 %v707_v59, %v634_v60  ;;  %v729_v0 = vadd.f32 %v728_v58, %v727_v56 }
 0x104   :  { %v709_v61 = vpop.f32.mrf.mxu0  ;;  %v730_v62 = vpop.f32.mrf.mxu1 }
 0x105   :  { %v710_v1 = vadd.f32 %v709_v61, %v708_v57  ;;  %v547_v5 = vadd.f32 %v729_v0, %v506_v63 }
 0x106   :  { %v731_v2 = vpop.f32.mrf.mxu1 }
 0x107   :  { %v509_v6 = vadd.f32 %v710_v1, %v634_v60  ;;  %v732_v7 = vadd.f32 %v731_v2, %v730_v62 }
 0x109   :  { %v550_v12 = vadd.f32 %v732_v7, %v509_v6 }
 0x11e   :  { %v749_v3 = vpop.f32.mrf.mxu0 }
 0x120   :  { %v750_v4 = vpop.f32.mrf.mxu0 }
 0x121   :  { %v751_v8 = vadd.f32 %v750_v4, %v749_v3 }
 0x122   :  { %v752_v9 = vpop.f32.mrf.mxu0 }
 0x123   :  { %v588_v10 = vadd.f32 %v751_v8, %v547_v5 }
 0x124   :  { %v753_v11 = vpop.f32.mrf.mxu0 }
 0x125   :  { %v754_v13 = vadd.f32 %v753_v11, %v752_v9  ;;  %594 = vmax.xlane.f32.xlu0 %v588_v10 }
 0x127   :  { %v591_v14 = vadd.f32 %v754_v13, %v550_v12 }
 0x129   :  { %596 = vmax.xlane.f32.xlu0 %v591_v14 }
 0x1ae   :  { %v595_v15 = vpop.xlane.xlu0 %594 }
 0x1af   :  { %v598_v16 = vsub.f32 %v588_v10, %v595_v15 }
 0x1b1   :  { %v600_v17 = vmul.f32 1.442695, %v598_v16 }
 0x1b2   :  { %v597_v18 = vpop.xlane.xlu0 %596 }
 0x1b3   :  { %v599_v19 = vsub.f32 %v591_v14, %v597_v18  ;;  %821 = vpow2.f32 %v600_v17 }
 0x1b5   :  { %v602_v20 = vmul.f32 1.442695, %v599_v19 }
 0x1b7   :  { %823 = vpow2.f32 %v602_v20 }
 0x1c0   :  { %v822_v21 = vpop.eup %821 }
 0x1c1   :  { %604 = vadd.xlane.f32.xlu1 %v822_v21 }
 0x1c4   :  { %v824_v22 = vpop.eup %823 }
 0x1c5   :  { %606 = vadd.xlane.f32.xlu1 %v824_v22 }
 0x24a   :  { %v605_v23 = vpop.xlane.xlu1 %604 }
 0x24b   :  { %825 = vlog2.f32 %v605_v23 }
 0x24e   :  { %v607_v24 = vpop.xlane.xlu1 %606 }
 0x24f   :  { %827 = vlog2.f32 %v607_v24 }
 0x258   :  { %v826_v25 = vpop.eup %825 }
 0x259   :  { %v609_v26 = vmul.f32 0.6931472, %v826_v25 }
 0x25b   :  { %v612_v27 = vsub.f32 %v598_v16, %v609_v26 }
 0x25c   :  { %v828_v28 = vpop.eup %827 }
 0x25d   :  { %614 = vst [vmem:[#allocation7] sm:$0xff] %v612_v27  ;;  %v611_v29 = vmul.f32 0.6931472, %v828_v28 }
 0x25f   :  { %v613_v30 = vsub.f32 %v599_v19, %v611_v29 }
 0x261   :  { %615 = vst [vmem:[#allocation7 + $0x8] sm:$0xff] %v613_v30 }
 0x262   :  { %880 = shalt.err (!%p877_p0)
}
 0x263   :  { %s902_s28 = smov 128   ;;  %s903_s29 = smov 8  }
 0x264   :  { %627 = dma.vmem_to_hbm [thread:$0]  %s622_s26, 256, %s939_s3, [#allocation4], %s902_s28, %s902_s28, %s903_s29  }
 0x265   :  { %893 = dma.done.wait [#allocation4], 256  }
 0x266   :  { %894 = vsyncadd [#allocation4], 4294967040 }
 0x267   :  { %631 = vsyncpa [#allocation3], 1 }
 0x268   :  { %632 = vsyncpa [#allocation6], 1 }
 0x269   :  { %633 = vsyncpa [#allocation4], 1 }

</bundles_post_ra>
